<compile_context>
chip_gen: v7x
topology: tpu7x:2x2x1
jax: 0.10.0
libtpu: 0.0.40
codegen_flags: <defaults>
</compile_context>

<pallas_src>
import jax
import jax.numpy as jnp
from jax.experimental import pallas as pl
from jax.experimental.pallas import tpu as pltpu

_LANES = 128


def _round_up(x, m):
    return ((x + m - 1) // m) * m


def _mse_sse_kernel(a_ref, b_ref, out_ref, acc_ref):
    """Accumulate sum((a-b)^2) over the reduction axis of the grid.

    acc_ref : VMEM (tile_rows, 128) f32 — elementwise accumulator (VPU only).
    out_ref : (1, 128) lane-dense per-split partial sums, written once at end.
    """
    k = pl.program_id(1)

    @pl.when(k == 0)
    def _init():
        acc_ref[...] = jnp.zeros_like(acc_ref)

    d = a_ref[...].astype(jnp.float32) - b_ref[...].astype(jnp.float32)
    acc_ref[...] += d * d

    @pl.when(k == pl.num_programs(1) - 1)
    def _finalize():
        # Single cross-sublane reduction per split, only at the last step.
        out_ref[...] = jnp.sum(acc_ref[...], axis=0, keepdims=True)


def mse_loss(q_eval, q_target, *, tile_rows=1024, min_kernel_elements=1 << 15):
    """Equivalent of torch.nn.functional.mse_loss(q_eval, q_target, 'mean')."""
    assert q_eval.shape == q_target.shape, "shape mismatch"
    n_elems = q_eval.size

    # Kilobyte-scale losses: fixed pallas_call launch/DMA-setup cost can never
    # win — use the fused XLA reduction instead.
    if n_elems < min_kernel_elements:
        d = q_eval.astype(jnp.float32) - q_target.astype(jnp.float32)
        return jnp.mean(d * d)

    # Keep native dtype; the kernel upcasts in-register.
    a = q_eval.reshape(-1)
    b = q_target.reshape(-1)

    rows = pl.cdiv(n_elems, _LANES)
    tile_rows = max(8, min(_round_up(tile_rows, 8), _round_up(rows, 8)))
    total_tiles = pl.cdiv(rows, tile_rows)
    # Split the row range across a leading "parallel" axis so v7x megacore can
    # shard it over its 2 TensorCores; harmless serial loop on v5e/v6e.
    nsplits = 2 if total_tiles >= 2 else 1
    steps = pl.cdiv(total_tiles, nsplits)
    padded_rows = nsplits * steps * tile_rows
    padded_elems = padded_rows * _LANES

    if padded_elems != n_elems:
        pad = padded_elems - n_elems
        a = jnp.pad(a, (0, pad))
        b = jnp.pad(b, (0, pad))  # equal zero padding -> zero SSE contribution
    a = a.reshape(padded_rows, _LANES)
    b = b.reshape(padded_rows, _LANES)

    in_spec = pl.BlockSpec((tile_rows, _LANES), lambda s, k: (s * steps + k, 0))
    partials = pl.pallas_call(
        _mse_sse_kernel,
        out_shape=jax.ShapeDtypeStruct((nsplits, 1, _LANES), jnp.float32),
        grid_spec=pltpu.PrefetchScalarGridSpec(
            num_scalar_prefetch=0,
            grid=(nsplits, steps),
            in_specs=[in_spec, in_spec],
            out_specs=pl.BlockSpec((None, 1, _LANES), lambda s, k: (s, 0, 0)),
            scratch_shapes=[pltpu.VMEM((tile_rows, _LANES), jnp.float32)],
        ),
        compiler_params=pltpu.CompilerParams(
            dimension_semantics=("parallel", "arbitrary"),
        ),
    )(a, b)

    sse = jnp.sum(partials)
    return (sse / jnp.float32(n_elems)).astype(jnp.float32)


def _ref_mse(a, b):
    d = a.astype(jnp.float32) - b.astype(jnp.float32)
    return jnp.mean(d * d)


if __name__ == "__main__":
    key = jax.random.PRNGKey(0)

    # Q-learning value-head style inputs (batch, heads, ...): small shapes.
    cases = [
        # shape, tile_rows (small tiles force multi-step / multi-split paths)
        (((2, 4, 16, 16), 1024)),   # 2048 elems: single tile, single split
        (((2, 4, 16, 16), 8)),      # 16 rows / tile 8: 2 parallel splits
        (((8, 4, 16, 16), 8)),      # 64 rows / tile 8: 2 splits x 4 steps
        (((3, 5, 7), 1024)),        # 105 elems: padding path (not /128)
    ]

    for idx, (shape, trows) in enumerate(cases):
        k1, k2, key = jax.random.split(key, 3)
        q_eval = jax.random.normal(k1, shape, dtype=jnp.float32)
        q_target = jax.random.normal(k2, shape, dtype=jnp.float32)

        # min_kernel_elements=0 forces the Pallas kernel path for these small
        # demo inputs (production default bypasses tiny inputs).
        loss = mse_loss(q_eval, q_target, tile_rows=trows, min_kernel_elements=0)
        jax.block_until_ready(loss)

        ref = _ref_mse(q_eval, q_target)
        assert jnp.allclose(loss, ref, rtol=1e-5, atol=1e-5), (idx, loss, ref)

    print("KERNEL_OK")
</pallas_src>

<mosaic_0001>
module attributes {stable_mosaic.version = 11 : i64} {
  func.func @_mse_sse_kernel(%arg0: i32, %arg1: i32, %arg2: memref<16x128xf32, #tpu.memory_space<vmem>>, %arg3: memref<16x128xf32, #tpu.memory_space<vmem>>, %arg4: memref<1x1x128xf32, #tpu.memory_space<vmem>>, %arg5: memref<16x128xf32, #tpu.memory_space<vmem>>) attributes {dimension_semantics = [#tpu.dimension_semantics<parallel>, #tpu.dimension_semantics<arbitrary>], iteration_bounds = array<i64: 1, 1>, scalar_prefetch = 0 : i64, scratch_operands = 1 : i64, tpu.core_type = #tpu.core_type<tc>, window_params = [{transform_indices = @transform_0, window_bounds = array<i64: 16, 128>}, {transform_indices = @transform_1, window_bounds = array<i64: 16, 128>}, {transform_indices = @transform_2, window_bounds = array<i64: 1, 1, 128>}]} {
    %c0_i32 = arith.constant 0 : i32
    %0 = arith.cmpi eq, %arg1, %c0_i32 : i32
    %1 = arith.extui %0 : i1 to i32
    %c0_i32_0 = arith.constant 0 : i32
    %2 = arith.cmpi ne, %1, %c0_i32_0 : i32
    scf.if %2 {
      %cst = arith.constant 0.000000e+00 : f32
      %13 = vector.broadcast %cst : f32 to vector<16x128xf32>
      %c0_10 = arith.constant 0 : index
      %c0_11 = arith.constant 0 : index
      %14 = vector.load %arg5[%c0_10, %c0_11] : memref<16x128xf32, #tpu.memory_space<vmem>>, vector<16x128xf32>
      tpu.vector_store %arg5[%c0_10, %c0_11], %13 {strides = array<i32>} : memref<16x128xf32, #tpu.memory_space<vmem>>, vector<16x128xf32>,
    } else {
    }
    %c0 = arith.constant 0 : index
    %c0_1 = arith.constant 0 : index
    %3 = vector.load %arg2[%c0, %c0_1] : memref<16x128xf32, #tpu.memory_space<vmem>>, vector<16x128xf32>
    %c0_2 = arith.constant 0 : index
    %c0_3 = arith.constant 0 : index
    %4 = vector.load %arg3[%c0_2, %c0_3] : memref<16x128xf32, #tpu.memory_space<vmem>>, vector<16x128xf32>
    %5 = arith.subf %3, %4 : vector<16x128xf32>
    %c0_4 = arith.constant 0 : index
    %c0_5 = arith.constant 0 : index
    %6 = vector.load %arg5[%c0_4, %c0_5] : memref<16x128xf32, #tpu.memory_space<vmem>>, vector<16x128xf32>
    %7 = arith.mulf %5, %5 : vector<16x128xf32>
    %8 = arith.addf %6, %7 : vector<16x128xf32>
    %c0_6 = arith.constant 0 : index
    %c0_7 = arith.constant 0 : index
    %9 = vector.load %arg5[%c0_6, %c0_7] : memref<16x128xf32, #tpu.memory_space<vmem>>, vector<16x128xf32>
    tpu.vector_store %arg5[%c0_6, %c0_7], %8 {strides = array<i32>} : memref<16x128xf32, #tpu.memory_space<vmem>>, vector<16x128xf32>,
    %c0_i32_8 = arith.constant 0 : i32
    %10 = arith.cmpi eq, %arg1, %c0_i32_8 : i32
    %11 = arith.extui %10 : i1 to i32
    %c0_i32_9 = arith.constant 0 : i32
    %12 = arith.cmpi ne, %11, %c0_i32_9 : i32
    scf.if %12 {
      %c0_10 = arith.constant 0 : index
      %c0_11 = arith.constant 0 : index
      %13 = vector.load %arg5[%c0_10, %c0_11] : memref<16x128xf32, #tpu.memory_space<vmem>>, vector<16x128xf32>
      %cst = arith.constant dense<0.000000e+00> : vector<128xf32>
      %14 = vector.multi_reduction <add>, %13, %cst [0] : vector<16x128xf32> to vector<128xf32>
      %15 = vector.shape_cast %14 : vector<128xf32> to vector<1x128xf32>
      %c0_12 = arith.constant 0 : index
      %c0_13 = arith.constant 0 : index
      %c0_14 = arith.constant 0 : index
      %16 = vector.load %arg4[%c0_12, %c0_13, %c0_14] : memref<1x1x128xf32, #tpu.memory_space<vmem>>, vector<1x1x128xf32>
      %17 = vector.shape_cast %16 : vector<1x1x128xf32> to vector<1x128xf32>
      %18 = vector.shape_cast %15 : vector<1x128xf32> to vector<1x1x128xf32>
      tpu.vector_store %arg4[%c0_12, %c0_13, %c0_14], %18 {strides = array<i32>} : memref<1x1x128xf32, #tpu.memory_space<vmem>>, vector<1x1x128xf32>,
    } else {
    }
    return
  }
  func.func @transform_0(%arg0: i32, %arg1: i32) -> (i32, i32) {
    %c1_i32 = arith.constant 1 : i32
    %0 = arith.muli %arg0, %c1_i32 : i32
    %1 = arith.addi %0, %arg1 : i32
    %c0_i32 = arith.constant 0 : i32
    %c0_i32_0 = arith.constant 0 : i32
    return %1, %c0_i32 : i32, i32
  }
  func.func @transform_1(%arg0: i32, %arg1: i32) -> (i32, i32) {
    %c1_i32 = arith.constant 1 : i32
    %0 = arith.muli %arg0, %c1_i32 : i32
    %1 = arith.addi %0, %arg1 : i32
    %c0_i32 = arith.constant 0 : i32
    %c0_i32_0 = arith.constant 0 : i32
    return %1, %c0_i32 : i32, i32
  }
  func.func @transform_2(%arg0: i32, %arg1: i32) -> (i32, i32, i32) {
    %c0_i32 = arith.constant 0 : i32
    %c0_i32_0 = arith.constant 0 : i32
    %c0_i32_1 = arith.constant 0 : i32
    return %arg0, %c0_i32, %c0_i32_0 : i32, i32, i32
  }
}

</mosaic_0001>

<bundles_post_ra>
// kernel: tpu_custom_call.1
= control target key start
LH: loop header
LB: loop body
LE: loop exit
PB: predicated region body
PF: predicated region fallthrough
CT: control target
= control target key end

     0   :  { %7 = vsyncpa [#allocation4], 0  ;;  %s234_s0 = inlined_call_operand.hbm [shape: f32[16,128], index: 0, kind: input, shape index: {}]   ;;  %s235_s1 = inlined_call_operand.hbm [shape: f32[16,128], index: 1, kind: input, shape index: {}]   ;;  %s236_s2 = inlined_call_operand.hbm [shape: f32[1,1,128], index: 2, kind: output, shape index: {}]  }
   0x1   :  { %8 = vsyncpa [#allocation7], 0 }
   0x2   :  { %9 = vsyncpa [#allocation5], 0  ;;  %s178_s9 = smov [#allocation3]   ;;  %s106_s13 = scalar_lea.hbm %s234_s0, 256 }
   0x3   :  { %s19_s10 = sshll.u32 %s178_s9, 4  ;;  %p107_p0 = scmp.ne.s32.totalorder %s234_s0, %s106_s13  ;;  %s20_s10 = int_to_ptr.vmem [resolvable:$true] %s19_s10 }
   0x4   :  { %p110_p1 = scmp.lt.u32.totalorder %s106_s13, %s234_s0 }
   0x6   :  { %p112_p2 = pnand %p110_p1, %p107_p0 }
   0x8   :  { %115 = shalt.err (!%p112_p2)
}
   0x9   :  { %s116_s18 = scalar_lea.vmem %s20_s10, 256  ;;  %p121_p4 = scmp.lt.s32.totalorder %s20_s10, %s20_s10 }
   0xa   :  { %p117_p3 = scmp.ne.s32.totalorder %s20_s10, %s116_s18  ;;  %p122_p5 = scmp.lt.s32.totalorder %s116_s18, %s116_s18 }
   0xc   :  { %p123_p6 = por %p122_p5, %p121_p4 }
   0xe   :  { %p124_p7 = pnand %p123_p6, %p117_p3 }
  0x10   :  { %127 = shalt.err (!%p124_p7)
}
  0x11   :  { %s179_s19 = smov 128   ;;  %s180_s20 = smov 8  }
  0x12   :  { %25 = dma.hbm_to_vmem [thread:$0]  %s234_s0, 256, %s20_s10, [#allocation4], %s179_s19, %s179_s19, %s180_s20  }
  0x13   :  { %s181_s23 = smov [#allocation6]   ;;  %s128_s27 = scalar_lea.hbm %s235_s1, 256 }
  0x14   :  { %s35_s24 = sshll.u32 %s181_s23, 4  ;;  %p129_p8 = scmp.ne.s32.totalorder %s235_s1, %s128_s27  ;;  %s36_s24 = int_to_ptr.vmem [resolvable:$true] %s35_s24 }
  0x15   :  { %p132_p9 = scmp.lt.u32.totalorder %s128_s27, %s235_s1 }
  0x17   :  { %p134_p10 = pnand %p132_p9, %p129_p8 }
  0x19   :  { %137 = shalt.err (!%p134_p10)
}
  0x1a   :  { %s138_s4 = scalar_lea.vmem %s36_s24, 256  ;;  %p143_p12 = scmp.lt.s32.totalorder %s36_s24, %s36_s24 }
  0x1b   :  { %p139_p11 = scmp.ne.s32.totalorder %s36_s24, %s138_s4  ;;  %p144_p13 = scmp.lt.s32.totalorder %s138_s4, %s138_s4 }
  0x1d   :  { %p145_p0 = por %p144_p13, %p143_p12 }
  0x1f   :  { %p146_p1 = pnand %p145_p0, %p139_p11 }
  0x21   :  { %149 = shalt.err (!%p146_p1)
}
  0x22   :  { %41 = dma.hbm_to_vmem [thread:$0]  %s235_s1, 256, %s36_s24, [#allocation7], %s179_s19, %s179_s19, %s180_s20  }
  0x23   :  { %172 = dma.done.wait [#allocation4], 256  }
  0x24   :  { %173 = vsyncadd [#allocation4], 4294967040 }
  0x25   :  { %174 = dma.done.wait [#allocation7], 256  }
  0x26   :  { %175 = vsyncadd [#allocation7], 4294967040  ;;  %v58_v0 = vld [vmem:[#allocation3] sm:$0xff]  ;;  %v59_v1 = vld [vmem:[#allocation3 + $0x8] sm:$0xff]  ;;  %s182_s6 = smov [#allocation8]  }
  0x27   :  { %v60_v2 = vld [vmem:[#allocation6] sm:$0xff]  ;;  %v61_v3 = vld [vmem:[#allocation6 + $0x8] sm:$0xff]  ;;  %s91_s7 = sshll.u32 %s182_s6, 4  ;;  %s92_s7 = int_to_ptr.vmem [resolvable:$true] %s91_s7 }
  0x28   :  { %v62_v4 = vsub.f32 %v58_v0, %v60_v2  ;;  %v63_v5 = vsub.f32 %v59_v1, %v61_v3  ;;  %s150_s1 = scalar_lea.vmem %s92_s7, 16  ;;  %s154_s8 = scalar_lea.vmem %s92_s7, 32 }
  0x29   :  { %p151_p2 = scmp.ne.s32.totalorder %s92_s7, %s150_s1  ;;  %p155_p3 = scmp.lt.s32.totalorder %s92_s7, %s92_s7 }
  0x2a   :  { %v66_v6 = vmul.f32 %v62_v4, %v62_v4  ;;  %v67_v7 = vmul.f32 %v63_v5, %v63_v5  ;;  %p156_p4 = scmp.lt.s32.totalorder %s154_s8, %s150_s1 }
  0x2c   :  { %v77_v8 = vadd.f32 %v67_v7, %v66_v6  ;;  %p157_p5 = por %p156_p4, %p155_p3 }
  0x2e   :  { %v78_v9 = vrot.slane %v77_v8, 4  ;;  %p158_p6 = pnand %p157_p5, %p151_p2 }
  0x30   :  { %v79_v10 = vadd.f32 %v78_v9, %v77_v8 }
  0x32   :  { %v80_v11 = vrot.slane %v79_v10, 2 }
  0x34   :  { %v81_v12 = vadd.f32 %v80_v11, %v79_v10 }
  0x36   :  { %v82_v13 = vrot.slane %v81_v12, 1 }
  0x38   :  { %v83_v14 = vadd.f32 %v82_v13, %v81_v12 }
  0x3a   :  { %84 = vst [vmem:[#allocation8] sm:$0x1] %v83_v14 }
  0x3b   :  { %161 = shalt.err (!%p158_p6)
}
  0x3c   :  { %s162_s11 = scalar_lea.hbm %s236_s2, 16 }
  0x3d   :  { %p163_p7 = scmp.ne.s32.totalorder %s236_s2, %s162_s11  ;;  %p166_p8 = scmp.lt.u32.totalorder %s162_s11, %s236_s2 }
  0x3f   :  { %p168_p9 = pnand %p166_p8, %p163_p7 }
  0x41   :  { %171 = shalt.err (!%p168_p9)
}
  0x42   :  { %94 = dma.vmem_to_hbm [thread:$0]  %s92_s7, 16, %s236_s2, [#allocation5]  }
  0x43   :  { %176 = dma.done.wait [#allocation5], 16  }
  0x44   :  { %177 = vsyncadd [#allocation5], 4294967280 }
  0x45   :  { %98 = vsyncpa [#allocation4], 1 }
  0x46   :  { %99 = vsyncpa [#allocation7], 1 }
  0x47   :  { %100 = vsyncpa [#allocation5], 1 }

</bundles_post_ra>
